<compile_context>
chip_gen: v6e
topology: v6e:2x2x1
jax: 0.10.0
libtpu: 0.0.40
codegen_flags: <defaults>
</compile_context>

<pallas_src>
import functools

import jax
import jax.numpy as jnp
from jax.experimental import pallas as pl
from jax.experimental.pallas import tpu as pltpu


def _round_up(x, m):
    return ((x + m - 1) // m) * m


# ----------------------------- kernels --------------------------------------


def _dropout_kernel_tpu(seed_ref, v_ref, out_ref, mask_ref, *, threshold, scale):
    """On-TPU path: hardware PRNG, no random-bits HBM traffic."""
    # Mix the block index into the seed so every grid step (and each TensorCore
    # on v7x, where the parallel axis is sharded) gets an independent stream.
    pltpu.prng_seed(seed_ref[0], pl.program_id(0))
    raw = pltpu.prng_random_bits(v_ref.shape)
    if raw.dtype != jnp.uint32:
        raw = pltpu.bitcast(raw, jnp.uint32)
    # u = bits / 2^32 ; keep iff u >= dropout  <=>  bits >= round(dropout * 2^32)
    keep = raw >= jnp.uint32(threshold)
    scale_v = jnp.asarray(scale, dtype=v_ref.dtype)
    out_ref[...] = jnp.where(keep, v_ref[...] * scale_v, jnp.zeros((), v_ref.dtype))
    mask_ref[...] = keep.astype(jnp.int8)


def _dropout_kernel_portable(v_ref, u_ref, out_ref, mask_ref, *, dropout, scale):
    """Fallback (interpret / non-TPU backends): uniforms streamed in as an input."""
    keep = u_ref[...] >= jnp.float32(dropout)
    scale_v = jnp.asarray(scale, dtype=v_ref.dtype)
    out_ref[...] = jnp.where(keep, v_ref[...] * scale_v, jnp.zeros((), v_ref.dtype))
    mask_ref[...] = keep.astype(jnp.int8)


# ----------------------------- wrapper ---------------------------------------


def dropout_sparse(values, seed, *, dropout, lanes=512, block_rows=1024):
    """values: (nnz,) float array (any float dtype, kept end-to-end).

    Returns (scaled_values (nnz,), keep_mask (nnz,) bool).
    Kept entries are values / keep_prob, dropped entries are exactly 0.
    """
    keep_prob = 1.0 - dropout
    if keep_prob <= 0.0:
        raise ValueError("dropout must be < 1.0")
    nnz = values.shape[0]
    scale = 1.0 / keep_prob
    dt = values.dtype  # native dtype end-to-end (bf16 halves I/O traffic)

    # Sublane-dense 2-D slab: lanes is a multiple of 128; block rows a multiple
    # of 32 so the int8 mask packs full vregs; pad so every block is full.
    lanes = _round_up(lanes, 128)
    rows_needed = pl.cdiv(nnz, lanes)
    block_rows = _round_up(max(32, min(block_rows, _round_up(rows_needed, 32))), 32)
    rows = _round_up(rows_needed, block_rows)
    padded = rows * lanes
    v2 = values if padded == nnz else jnp.pad(values, (0, padded - nnz))
    v2 = v2.reshape(rows, lanes)
    grid = (rows // block_rows,)

    def blk():
        return pl.BlockSpec((block_rows, lanes), lambda i, *_: (i, 0))

    out_shapes = (
        jax.ShapeDtypeStruct((rows, lanes), dt),
        jax.ShapeDtypeStruct((rows, lanes), jnp.int8),
    )

    if jax.default_backend() == "tpu":
        threshold = min(int(round(dropout * (1 << 32))), (1 << 32) - 1)
        bytes_per_elem = 2 * jnp.dtype(dt).itemsize + 1  # v in, v out, mask out
        out_v, out_m = pl.pallas_call(
            functools.partial(_dropout_kernel_tpu, threshold=threshold, scale=scale),
            out_shape=out_shapes,
            grid_spec=pltpu.PrefetchScalarGridSpec(
                num_scalar_prefetch=1,          # seed scalar lands in SMEM
                grid=grid,
                in_specs=[blk()],
                out_specs=(blk(), blk()),
            ),
            compiler_params=pltpu.CompilerParams(
                dimension_semantics=("parallel",)),
            cost_estimate=pl.CostEstimate(
                flops=padded, transcendentals=0,
                bytes_accessed=padded * bytes_per_elem),
        )(jnp.asarray([seed], dtype=jnp.int32), v2)
    else:
        # TODO(synk): pltpu.prng_* has no CPU/interpret lowering; stream
        # precomputed uniforms instead (extra HBM traffic; TPU path avoids it).
        u = jax.random.uniform(jax.random.PRNGKey(seed), (rows, lanes),
                               dtype=jnp.float32)
        out_v, out_m = pl.pallas_call(
            functools.partial(_dropout_kernel_portable, dropout=dropout, scale=scale),
            out_shape=out_shapes,
            grid=grid,
            in_specs=[blk(), blk()],
            out_specs=(blk(), blk()),
        )(v2, u)

    scaled = out_v.reshape(padded)[:nnz]
    keep_mask = out_m.reshape(padded)[:nnz].astype(bool)
    return scaled, keep_mask


if __name__ == "__main__":
    key = jax.random.PRNGKey(0)
    k_idx_r, k_idx_c, k_val = jax.random.split(key, 3)

    # Small synthetic sparse tensor: dense shape (16, 32), feats_nonzero = 256.
    dense_shape = (16, 32)
    feats_nonzero = 256
    dropout = 0.5

    rows_i = jax.random.randint(k_idx_r, (feats_nonzero,), 0, dense_shape[0], dtype=jnp.int32)
    cols_i = jax.random.randint(k_idx_c, (feats_nonzero,), 0, dense_shape[1], dtype=jnp.int32)
    indices = jnp.stack([rows_i, cols_i], axis=0)  # (2, nnz) -- plain JAX glue
    values = jax.random.normal(k_val, (feats_nonzero,), dtype=jnp.float32)

    scaled_values, keep_mask = dropout_sparse(values, seed=42, dropout=dropout)
    jax.block_until_ready((scaled_values, keep_mask))

    # Sanity: kept entries scaled by 1/keep_prob, dropped entries exactly zero.
    keep_prob = 1.0 - dropout
    expected_kept = values * (1.0 / keep_prob)
    ok = bool(
        jnp.all(
            jnp.where(
                keep_mask,
                jnp.abs(scaled_values - expected_kept) < 1e-5,
                scaled_values == 0.0,
            )
        )
    )
    assert ok, "sparse dropout semantics mismatch"

    # Mask should not be degenerate (very loose statistical bound).
    frac_kept = float(jnp.mean(keep_mask.astype(jnp.float32)))
    assert 0.1 < frac_kept < 0.9, f"degenerate dropout mask (kept {frac_kept:.2f})"

    # Host-side compaction of the COO arrays (the PyTorch module's output form).
    kept_indices = indices[:, keep_mask]
    kept_values = scaled_values[keep_mask]
    assert kept_indices.shape[1] == kept_values.shape[0]

    assert scaled_values.shape == (feats_nonzero,)
    assert keep_mask.shape == (feats_nonzero,) and keep_mask.dtype == jnp.bool_
    print("KERNEL_OK")
</pallas_src>

<mosaic_0001>
module attributes {stable_mosaic.version = 11 : i64} {
  func.func @_dropout_kernel_portable(%arg0: i32, %arg1: memref<32x512xf32, #tpu.memory_space<vmem>>, %arg2: memref<32x512xf32, #tpu.memory_space<vmem>>, %arg3: memref<32x512xf32, #tpu.memory_space<vmem>>, %arg4: memref<32x512xi8, #tpu.memory_space<vmem>>) attributes {dimension_semantics = [#tpu.dimension_semantics<arbitrary>], iteration_bounds = array<i64: 1>, scalar_prefetch = 0 : i64, scratch_operands = 0 : i64, tpu.core_type = #tpu.core_type<tc>, window_params = [{transform_indices = @transform_0, window_bounds = array<i64: 32, 512>}, {transform_indices = @transform_1, window_bounds = array<i64: 32, 512>}, {transform_indices = @transform_2, window_bounds = array<i64: 32, 512>}, {transform_indices = @transform_3, window_bounds = array<i64: 32, 512>}]} {
    %c0 = arith.constant 0 : index
    %c0_0 = arith.constant 0 : index
    %0 = vector.load %arg2[%c0, %c0_0] : memref<32x512xf32, #tpu.memory_space<vmem>>, vector<32x512xf32>
    %cst = arith.constant 5.000000e-01 : f32
    %1 = vector.broadcast %cst : f32 to vector<32x512xf32>
    %2 = arith.cmpf oge, %0, %1 : vector<32x512xf32>
    %c0_1 = arith.constant 0 : index
    %c0_2 = arith.constant 0 : index
    %3 = vector.load %arg1[%c0_1, %c0_2] : memref<32x512xf32, #tpu.memory_space<vmem>>, vector<32x512xf32>
    %cst_3 = arith.constant 2.000000e+00 : f32
    %4 = vector.broadcast %cst_3 : f32 to vector<32x512xf32>
    %5 = arith.mulf %3, %4 : vector<32x512xf32>
    %cst_4 = arith.constant 0.000000e+00 : f32
    %6 = vector.broadcast %cst_4 : f32 to vector<32x512xf32>
    %7 = arith.select %2, %5, %6 : vector<32x512xi1>, vector<32x512xf32>
    %c0_5 = arith.constant 0 : index
    %c0_6 = arith.constant 0 : index
    %8 = vector.load %arg3[%c0_5, %c0_6] : memref<32x512xf32, #tpu.memory_space<vmem>>, vector<32x512xf32>
    tpu.vector_store %arg3[%c0_5, %c0_6], %7 {strides = array<i32>} : memref<32x512xf32, #tpu.memory_space<vmem>>, vector<32x512xf32>,
    %9 = arith.extui %2 : vector<32x512xi1> to vector<32x512xi8>
    %c0_7 = arith.constant 0 : index
    %c0_8 = arith.constant 0 : index
    %10 = vector.load %arg4[%c0_7, %c0_8] : memref<32x512xi8, #tpu.memory_space<vmem>>, vector<32x512xi8>
    tpu.vector_store %arg4[%c0_7, %c0_8], %9 {strides = array<i32>} : memref<32x512xi8, #tpu.memory_space<vmem>>, vector<32x512xi8>,
    return
  }
  func.func @transform_0(%arg0: i32) -> (i32, i32) {
    %c0_i32 = arith.constant 0 : i32
    %c0_i32_0 = arith.constant 0 : i32
    return %arg0, %c0_i32 : i32, i32
  }
  func.func @transform_1(%arg0: i32) -> (i32, i32) {
    %c0_i32 = arith.constant 0 : i32
    %c0_i32_0 = arith.constant 0 : i32
    return %arg0, %c0_i32 : i32, i32
  }
  func.func @transform_2(%arg0: i32) -> (i32, i32) {
    %c0_i32 = arith.constant 0 : i32
    %c0_i32_0 = arith.constant 0 : i32
    return %arg0, %c0_i32 : i32, i32
  }
  func.func @transform_3(%arg0: i32) -> (i32, i32) {
    %c0_i32 = arith.constant 0 : i32
    %c0_i32_0 = arith.constant 0 : i32
    return %arg0, %c0_i32 : i32, i32
  }
}

</mosaic_0001>

<bundles_post_ra>
// kernel: tpu_custom_call.1
= control target key start
LH: loop header
LB: loop body
LE: loop exit
PB: predicated region body
PF: predicated region fallthrough
CT: control target
= control target key end

     0   :  { %9 = vsyncpa [#allocation3], 0  ;;  %s401_s0 = inlined_call_operand.hbm [shape: f32[32,512], index: 0, kind: input, shape index: {}]   ;;  %s402_s1 = inlined_call_operand.hbm [shape: f32[32,512], index: 1, kind: input, shape index: {}]   ;;  %s403_s2 = inlined_call_operand.hbm [shape: f32[32,512], index: 2, kind: output, shape index: {0}]   ;;  %s404_s3 = inlined_call_operand.hbm [shape: s8[32,512], index: 3, kind: output, shape index: {1}]  }
   0x1   :  { %10 = vsyncpa [#allocation6], 0 }
   0x2   :  { %11 = vsyncpa [#allocation4], 0 }
   0x3   :  { %12 = vsyncpa [#allocation9], 0  ;;  %s288_s12 = smov [#allocation2]  }
   0x4   :  { %s18_s13 = sshll.u32 %s288_s12, 4  ;;  %s19_s13 = int_to_ptr.vmem [resolvable:$true] %s18_s13 }
   0x5   :  { %s208_s14 = scalar_lea.vmem %s19_s13, 2048  ;;  %p213_p1 = scmp.lt.s32.totalorder %s19_s13, %s19_s13 }
   0x6   :  { %p209_p0 = scmp.ne.s32.totalorder %s19_s13, %s208_s14  ;;  %p214_p2 = scmp.lt.s32.totalorder %s208_s14, %s208_s14 }
   0x8   :  { %p215_p3 = por %p214_p2, %p213_p1 }
   0xa   :  { %p216_p4 = pnand %p215_p3, %p209_p0 }
   0xc   :  { %219 = shalt.err (!%p216_p4)
}
   0xd   :  { %s289_s15 = smov 512   ;;  %s290_s16 = smov 32  }
   0xe   :  { %24 = dma.hbm_to_vmem [thread:$0]  %s401_s0, 2048, %s19_s13, [#allocation3], %s289_s15, %s289_s15, %s290_s16  }
   0xf   :  { %s291_s19 = smov [#allocation5]  }
  0x10   :  { %s30_s20 = sshll.u32 %s291_s19, 4  ;;  %s31_s20 = int_to_ptr.vmem [resolvable:$true] %s30_s20 }
  0x11   :  { %s228_s21 = scalar_lea.vmem %s31_s20, 2048  ;;  %p233_p6 = scmp.lt.s32.totalorder %s31_s20, %s31_s20 }
  0x12   :  { %p229_p5 = scmp.ne.s32.totalorder %s31_s20, %s228_s21  ;;  %p234_p7 = scmp.lt.s32.totalorder %s228_s21, %s228_s21 }
  0x14   :  { %p235_p8 = por %p234_p7, %p233_p6 }
  0x16   :  { %p236_p9 = pnand %p235_p8, %p229_p5 }
  0x18   :  { %239 = shalt.err (!%p236_p9)
}
  0x19   :  { %36 = dma.hbm_to_vmem [thread:$0]  %s402_s1, 2048, %s31_s20, [#allocation6], %s289_s15, %s289_s15, %s290_s16  }
  0x1a   :  { %280 = dma.done.wait [#allocation3], 2048  }
  0x1b   :  { %281 = vsyncadd [#allocation3], 4294965248 }
  0x1c   :  { %282 = dma.done.wait [#allocation6], 2048  }
  0x1d   :  { %283 = vsyncadd [#allocation6], 4294965248  ;;  %v45_v0 = vld [vmem:[#allocation5] sm:$0xff]  ;;  %v46_v2 = vld [vmem:[#allocation5 + $0x8] sm:$0xff]  ;;  %s292_s0 = smov [#allocation7]   ;;  %s294_s1 = smov [#allocation8]  }
  0x1e   :  { %v77_v1 = vld [vmem:[#allocation2] sm:$0xff]  ;;  %s327_s24 = sshll.u32 %s292_s0, 4  ;;  %vm61_vm0 = vcmp.ge.f32.partialorder %v45_v0, 0.5  ;;  %vm62_vm1 = vcmp.ge.f32.partialorder %v46_v2, 0.5  ;;  %v78_v4 = vld [vmem:[#allocation2 + $0x8] sm:$0xff]  ;;  %v47_v5 = vld [vmem:[#allocation5 + $0x10] sm:$0xff]  ;;  %s167_s24 = int_to_ptr.vmem [resolvable:$true] %s327_s24 }
  0x1f   :  { %v93_v3 = vmul.f32 2.0, %v77_v1  ;;  %v79_v6 = vld [vmem:[#allocation2 + $0x10] sm:$0xff]  ;;  %v94_v7 = vmul.f32 2.0, %v78_v4  ;;  %vm63_vm2 = vcmp.ge.f32.partialorder %v47_v5, 0.5  ;;  %v48_v9 = vld [vmem:[#allocation5 + $0x18] sm:$0xff]  ;;  %v49_v11 = vld [vmem:[#allocation5 + $0x20] sm:$0xff]  ;;  %p245_p11 = scmp.lt.s32.totalorder %s167_s24, %s167_s24 }
  0x20   :  { %v95_v8 = vmul.f32 2.0, %v79_v6  ;;  %v80_v10 = vld [vmem:[#allocation2 + $0x18] sm:$0xff]  ;;  %vm64_vm3 = vcmp.ge.f32.partialorder %v48_v9, 0.5  ;;  %vm65_vm4 = vcmp.ge.f32.partialorder %v49_v11, 0.5  ;;  %v81_v14 = vld [vmem:[#allocation2 + $0x20] sm:$0xff]  ;;  %v50_v15 = vld [vmem:[#allocation5 + $0x28] sm:$0xff] }
  0x21   :  { %v109_v12 = vsel %vm61_vm0, %v93_v3, 0.0  ;;  %v96_v13 = vmul.f32 2.0, %v80_v10  ;;  %v110_v16 = vsel %vm62_vm1, %v94_v7, 0.0  ;;  %v97_v18 = vmul.f32 2.0, %v81_v14  ;;  %v82_v19 = vld [vmem:[#allocation2 + $0x28] sm:$0xff]  ;;  %v51_v20 = vld [vmem:[#allocation5 + $0x30] sm:$0xff]  ;;  %vm334_vm6 = vmpackc.low %vm65_vm4, %vm61_vm0 }
  0x22   :  { %125 = vst [vmem:[#allocation7] sm:$0xff] %v109_v12  ;;  %v111_v17 = vsel %vm63_vm2, %v95_v8, 0.0  ;;  %vm66_vm5 = vcmp.ge.f32.partialorder %v50_v15, 0.5  ;;  %126 = vst [vmem:[#allocation7 + $0x8] sm:$0xff] %v110_v16  ;;  %v98_v23 = vmul.f32 2.0, %v82_v19  ;;  %vm67_vm7 = vcmp.ge.f32.partialorder %v51_v20, 0.5 }
  0x23   :  { %127 = vst [vmem:[#allocation7 + $0x10] sm:$0xff] %v111_v17  ;;  %v112_v22 = vsel %vm64_vm3, %v96_v13, 0.0  ;;  %v83_v24 = vld [vmem:[#allocation2 + $0x30] sm:$0xff]  ;;  %v52_v25 = vld [vmem:[#allocation5 + $0x38] sm:$0xff]  ;;  %v113_v27 = vsel %vm65_vm4, %v97_v18, 0.0  ;;  %v53_v30 = vld [vmem:[#allocation5 + $0x40] sm:$0xff] }
  0x24   :  { %v84_v26 = vld [vmem:[#allocation2 + $0x38] sm:$0xff]  ;;  %128 = vst [vmem:[#allocation7 + $0x18] sm:$0xff] %v112_v22  ;;  %v99_v28 = vmul.f32 2.0, %v83_v24  ;;  %vm68_vm8 = vcmp.ge.f32.partialorder %v52_v25, 0.5  ;;  %v85_v31 = vld [vmem:[#allocation2 + $0x40] sm:$0xff]  ;;  %vm342_vm9 = vmpackc.low %vm66_vm5, %vm62_vm1  ;;  %v114_v33 = vsel %vm66_vm5, %v98_v23, 0.0 }
  0x25   :  { %v100_v29 = vmul.f32 2.0, %v84_v26  ;;  %129 = vst [vmem:[#allocation7 + $0x20] sm:$0xff] %v113_v27  ;;  %vm69_vm10 = vcmp.ge.f32.partialorder %v53_v30, 0.5  ;;  %v101_v34 = vmul.f32 2.0, %v85_v31  ;;  %v54_v35 = vld [vmem:[#allocation5 + $0x48] sm:$0xff]  ;;  %v55_v37 = vld [vmem:[#allocation5 + $0x50] sm:$0xff]  ;;  %vm351_vm12 = vmpackc.low %vm67_vm7, %vm63_vm2 }
  0x26   :  { %v86_v36 = vld [vmem:[#allocation2 + $0x48] sm:$0xff]  ;;  %130 = vst [vmem:[#allocation7 + $0x28] sm:$0xff] %v114_v33  ;;  %v115_v38 = vsel %vm67_vm7, %v99_v28, 0.0  ;;  %vm70_vm11 = vcmp.ge.f32.partialorder %v54_v35, 0.5  ;;  %v87_v41 = vld [vmem:[#allocation2 + $0x50] sm:$0xff]  ;;  %v56_v42 = vld [vmem:[#allocation5 + $0x58] sm:$0xff] }
  0x27   :  { %v116_v39 = vsel %vm68_vm8, %v100_v29, 0.0  ;;  %v102_v40 = vmul.f32 2.0, %v86_v36  ;;  %131 = vst [vmem:[#allocation7 + $0x30] sm:$0xff] %v115_v38  ;;  %v117_v44 = vsel %vm69_vm10, %v101_v34, 0.0  ;;  %vm71_vm13 = vcmp.ge.f32.partialorder %v55_v37, 0.5  ;;  %v88_v46 = vld [vmem:[#allocation2 + $0x58] sm:$0xff]  ;;  %vm358_vm15 = vmpackc.low %vm68_vm8, %vm64_vm3 }
  0x28   :  { %132 = vst [vmem:[#allocation7 + $0x38] sm:$0xff] %v116_v39  ;;  %v103_v45 = vmul.f32 2.0, %v87_v41  ;;  %vm72_vm14 = vcmp.ge.f32.partialorder %v56_v42, 0.5  ;;  %v57_v47 = vld [vmem:[#allocation5 + $0x60] sm:$0xff]  ;;  %133 = vst [vmem:[#allocation7 + $0x40] sm:$0xff] %v117_v44  ;;  %v104_v50 = vmul.f32 2.0, %v88_v46 }
  0x29   :  { %v118_v49 = vsel %vm70_vm11, %v102_v40, 0.0  ;;  %vm73_vm0 = vcmp.ge.f32.partialorder %v57_v47, 0.5  ;;  %v89_v51 = vld [vmem:[#allocation2 + $0x60] sm:$0xff]  ;;  %v58_v52 = vld [vmem:[#allocation5 + $0x68] sm:$0xff]  ;;  %v59_v57 = vld [vmem:[#allocation5 + $0x70] sm:$0xff]  ;;  %v293_v4 = vmov 0  }
  0x2a   :  { %v90_v53 = vld [vmem:[#allocation2 + $0x68] sm:$0xff]  ;;  %134 = vst [vmem:[#allocation7 + $0x48] sm:$0xff] %v118_v49  ;;  %v119_v54 = vsel %vm71_vm13, %v103_v45, 0.0  ;;  %v105_v55 = vmul.f32 2.0, %v89_v51  ;;  %vm74_vm1 = vcmp.ge.f32.partialorder %v58_v52, 0.5  ;;  %v91_v58 = vld [vmem:[#allocation2 + $0x70] sm:$0xff]  ;;  %vm366_vm2 = vmpackc.low %vm73_vm0, %vm69_vm10 }
  0x2b   :  { %v106_v56 = vmul.f32 2.0, %v90_v53  ;;  %135 = vst [vmem:[#allocation7 + $0x50] sm:$0xff] %v119_v54  ;;  %v120_v60 = vsel %vm72_vm14, %v104_v50, 0.0  ;;  %vm75_vm3 = vcmp.ge.f32.partialorder %v59_v57, 0.5  ;;  %v107_v61 = vmul.f32 2.0, %v91_v58  ;;  %v60_v62 = vld [vmem:[#allocation5 + $0x78] sm:$0xff]  ;;  %vm143_vm4 = vmpackc.even %vm366_vm2, %vm334_vm6 }
  0x2c   :  { %v92_v63 = vld [vmem:[#allocation2 + $0x78] sm:$0xff]  ;;  %136 = vst [vmem:[#allocation7 + $0x58] sm:$0xff] %v120_v60  ;;  %v121_v0 = vsel %vm73_vm0, %v105_v55, 0.0  ;;  %vm145_vm5 = vmpackc.low %vm74_vm1, %vm70_vm11  ;;  %vm76_vm7 = vcmp.ge.f32.partialorder %v60_v62, 0.5  ;;  %v153_v5 = vsel %vm143_vm4, 16843009, %v293_v4 }
  0x2d   :  { %v122_v1 = vsel %vm74_vm1, %v106_v56, 0.0  ;;  %v108_v2 = vmul.f32 2.0, %v92_v63  ;;  %137 = vst [vmem:[#allocation7 + $0x60] sm:$0xff] %v121_v0  ;;  %v123_v3 = vsel %vm75_vm3, %v107_v61, 0.0  ;;  %vm146_vm8 = vmpackc.even %vm145_vm5, %vm342_vm9  ;;  %s179_s25 = sshll.u32 %s294_s1, 4  ;;  %s240_s26 = scalar_lea.vmem %s167_s24, 2048  ;;  %s180_s25 = int_to_ptr.vmem [resolvable:$true] %s179_s25 }
  0x2e   :  { %138 = vst [vmem:[#allocation7 + $0x68] sm:$0xff] %v122_v1  ;;  %139 = vst [vmem:[#allocation7 + $0x70] sm:$0xff] %v123_v3  ;;  %v154_v7 = vsel %vm146_vm8, 16843009, %v293_v4  ;;  %p241_p10 = scmp.ne.s32.totalorder %s167_s24, %s240_s26  ;;  %p246_p12 = scmp.lt.s32.totalorder %s240_s26, %s240_s26 }
  0x2f   :  { %v124_v6 = vsel %vm76_vm7, %v108_v2, 0.0  ;;  %157 = vst [vmem:[#allocation8] sm:$0xff] %v153_v5  ;;  %vm148_vm6 = vmpackc.low %vm75_vm3, %vm71_vm13 }
  0x30   :  { %140 = vst [vmem:[#allocation7 + $0x78] sm:$0xff] %v124_v6  ;;  %158 = vst [vmem:[#allocation8 + $0x8] sm:$0xff] %v154_v7  ;;  %p247_p13 = por %p246_p12, %p245_p11 }
  0x31   :  { %vm149_vm10 = vmpackc.even %vm148_vm6, %vm351_vm12 }
  0x32   :  { %v155_v8 = vsel %vm149_vm10, 16843009, %v293_v4  ;;  %vm151_vm9 = vmpackc.low %vm76_vm7, %vm72_vm14  ;;  %p248_p0 = pnand %p247_p13, %p241_p10 }
  0x34   :  { %251 = shalt.err (!%p248_p0)
}
  0x35   :  { %172 = dma.vmem_to_hbm [thread:$0]  %s167_s24, 2048, %s403_s2, [#allocation4], %s289_s15, %s289_s15, %s290_s16   ;;  %159 = vst [vmem:[#allocation8 + $0x10] sm:$0xff] %v155_v8  ;;  %vm152_vm11 = vmpackc.even %vm151_vm9, %vm358_vm15 }
  0x36   :  { %v156_v9 = vsel %vm152_vm11, 16843009, %v293_v4  ;;  %s260_s29 = scalar_lea.vmem %s180_s25, 512  ;;  %p265_p2 = scmp.lt.s32.totalorder %s180_s25, %s180_s25 }
  0x37   :  { %160 = vst [vmem:[#allocation8 + $0x18] sm:$0xff] %v156_v9  ;;  %p261_p1 = scmp.ne.s32.totalorder %s180_s25, %s260_s29  ;;  %p266_p3 = scmp.lt.s32.totalorder %s260_s29, %s260_s29 }
  0x39   :  { %p267_p4 = por %p266_p3, %p265_p2 }
  0x3b   :  { %p268_p5 = pnand %p267_p4, %p261_p1 }
  0x3d   :  { %271 = shalt.err (!%p268_p5)
}
  0x3e   :  { %182 = dma.vmem_to_hbm [thread:$0]  %s180_s25, 512, %s404_s3, [#allocation9]  }
  0x3f   :  { %284 = dma.done.wait [#allocation4], 2048  }
  0x40   :  { %285 = vsyncadd [#allocation4], 4294965248 }
  0x41   :  { %286 = dma.done.wait [#allocation9], 512  }
  0x42   :  { %287 = vsyncadd [#allocation9], 4294966784 }
  0x43   :  { %189 = vsyncpa [#allocation3], 1 }
  0x44   :  { %190 = vsyncpa [#allocation6], 1 }
  0x45   :  { %191 = vsyncpa [#allocation4], 1 }
  0x46   :  { %192 = vsyncpa [#allocation9], 1 }

</bundles_post_ra>
